<compile_context>
chip_gen: v6e
topology: v6e:2x2x1
jax: 0.10.0
libtpu: 0.0.40
codegen_flags: <defaults>
</compile_context>

<pallas_src>
import functools

import jax
import jax.numpy as jnp
from jax.experimental import pallas as pl
from jax.experimental.pallas import tpu as pltpu

_LANE = 128
_SUBLANE = 8


def _round_up(n: int, m: int) -> int:
    return ((n + m - 1) // m) * m


# ----------------------------- kernel --------------------------------------


def generator_mixture_kernel(x_ref,
                             w1_ref, b1_ref,
                             w2_ref, b2_ref,
                             w3_ref, b3_ref,
                             w4_ref, b4_ref,
                             out_ref):
    """Fused 4-layer MLP (Linear+ReLU x3, then Linear) on one batch tile."""
    x = x_ref[...]
    h = jnp.dot(x, w1_ref[...], preferred_element_type=jnp.float32) + b1_ref[...]
    h = jnp.maximum(h, 0.0)
    h = jnp.dot(h, w2_ref[...], preferred_element_type=jnp.float32) + b2_ref[...]
    h = jnp.maximum(h, 0.0)
    h = jnp.dot(h, w3_ref[...], preferred_element_type=jnp.float32) + b3_ref[...]
    h = jnp.maximum(h, 0.0)
    # Final layer: output width is padded to a multiple of 128 lanes, so this
    # store is lane-dense (no masked vst.msk).
    out_ref[...] = (
        jnp.dot(h, w4_ref[...], preferred_element_type=jnp.float32) + b4_ref[...]
    )


# ----------------------------- params --------------------------------------


def init_params(key, z_dim, hidden_size, data_dim):
    """PyTorch-style Linear init, stored pre-transposed as (in, out).

    The last layer's weight/bias are zero-padded along the output feature dim
    to a multiple of 128 so the kernel's output stores are lane-dense.
    """
    dims = [
        (z_dim, hidden_size),            # l1
        (hidden_size, 2 * hidden_size),  # l2
        (2 * hidden_size, hidden_size),  # l3
        (hidden_size, data_dim),         # l4
    ]
    ks = jax.random.split(key, 2 * len(dims))
    params = {}
    for li, (fan_in, fan_out) in enumerate(dims, start=1):
        bound = 1.0 / jnp.sqrt(jnp.float32(fan_in))
        w = jax.random.uniform(ks[2 * (li - 1)], (fan_in, fan_out),
                               jnp.float32, -bound, bound)      # (in, out)
        b = jax.random.uniform(ks[2 * (li - 1) + 1], (1, fan_out),
                               jnp.float32, -bound, bound)      # (1, out)
        if li == 4:  # lane-dense output padding (extra columns are zero)
            out_pad = _round_up(fan_out, _LANE)
            w = jnp.pad(w, ((0, 0), (0, out_pad - fan_out)))
            b = jnp.pad(b, ((0, 0), (0, out_pad - fan_out)))
        params[f"w{li}"] = w
        params[f"b{li}"] = b
    return params


# ----------------------------- wrapper --------------------------------------


def _pick_batch_tile(bs: int, target: int = 2048) -> int:
    """Batch tile: multiple of 8, capped at `target`, and capped at ~bs/2 so
    a large batch always yields >=2 'parallel' grid steps (both v7x TCs)."""
    tile = _round_up(max(min(bs, target), 1), _SUBLANE)
    if bs > _SUBLANE:
        tile = min(tile, _round_up(-(-bs // 2), _SUBLANE))
    return tile


@functools.partial(jax.jit, static_argnames=("data_dim",))
def generator_mixture_forward(params, x, *, data_dim):
    bs, z_dim = x.shape
    hidden = params["w1"].shape[1]
    out_pad = params["w4"].shape[1]          # padded (lane-dense) output width
    assert params["w1"].shape[0] == z_dim
    assert params["w2"].shape == (hidden, 2 * hidden)
    assert params["w3"].shape == (2 * hidden, hidden)
    assert params["w4"].shape[0] == hidden
    assert out_pad % _LANE == 0 and out_pad >= data_dim

    tile_b = _pick_batch_tile(bs)
    grid = (pl.cdiv(bs, tile_b),)

    def row_map(i):
        return (i, 0)

    def const_map(i):
        return (0, 0)

    def full_spec(arr):
        # Whole-array block, constant index_map: fetched once, resident in
        # VMEM across grid steps.  (Single-buffering these via pl.Buffered(1)
        # would save a dead second buffer; skipped — negligible at this size.)
        return pl.BlockSpec(arr.shape, const_map)

    in_specs = [
        pl.BlockSpec((tile_b, z_dim), row_map),          # x tile
        full_spec(params["w1"]), full_spec(params["b1"]),
        full_spec(params["w2"]), full_spec(params["b2"]),
        full_spec(params["w3"]), full_spec(params["b3"]),
        full_spec(params["w4"]), full_spec(params["b4"]),
    ]
    out_specs = pl.BlockSpec((tile_b, out_pad), row_map)

    y_padded = pl.pallas_call(
        generator_mixture_kernel,
        out_shape=jax.ShapeDtypeStruct((bs, out_pad), jnp.float32),
        grid=grid,
        in_specs=in_specs,
        out_specs=out_specs,
        compiler_params=pltpu.CompilerParams(
            dimension_semantics=("parallel",)),
    )(x,
      params["w1"], params["b1"],
      params["w2"], params["b2"],
      params["w3"], params["b3"],
      params["w4"], params["b4"])

    return y_padded[:, :data_dim]


# ----------------------------- reference & main -----------------------------


def _reference_forward(params, x, data_dim):
    h = jnp.maximum(x @ params["w1"] + params["b1"], 0.0)
    h = jnp.maximum(h @ params["w2"] + params["b2"], 0.0)
    h = jnp.maximum(h @ params["w3"] + params["b3"], 0.0)
    y = h @ params["w4"] + params["b4"]
    return y[:, :data_dim]


if __name__ == "__main__":
    z_dim, hidden_size, data_dim = 8, 32, 12
    bs = 64

    key = jax.random.PRNGKey(0)
    kp, kx = jax.random.split(key)
    params = init_params(kp, z_dim, hidden_size, data_dim)
    x = jax.random.normal(kx, (bs, z_dim), jnp.float32)

    y = generator_mixture_forward(params, x, data_dim=data_dim)
    y = jax.block_until_ready(y)

    assert y.shape == (bs, data_dim)
    assert bool(jnp.all(jnp.isfinite(y)))

    y_ref = _reference_forward(params, x, data_dim)
    assert bool(jnp.allclose(y, y_ref, atol=1e-5, rtol=1e-5))

    print("KERNEL_OK")
</pallas_src>

<mosaic_0001>
module attributes {stable_mosaic.version = 11 : i64} {
  func.func @generator_mixture_kernel(%arg0: i32, %arg1: memref<32x8xf32, #tpu.memory_space<vmem>>, %arg2: memref<8x32xf32, #tpu.memory_space<vmem>>, %arg3: memref<1x32xf32, #tpu.memory_space<vmem>>, %arg4: memref<32x64xf32, #tpu.memory_space<vmem>>, %arg5: memref<1x64xf32, #tpu.memory_space<vmem>>, %arg6: memref<64x32xf32, #tpu.memory_space<vmem>>, %arg7: memref<1x32xf32, #tpu.memory_space<vmem>>, %arg8: memref<32x128xf32, #tpu.memory_space<vmem>>, %arg9: memref<1x128xf32, #tpu.memory_space<vmem>>, %arg10: memref<32x128xf32, #tpu.memory_space<vmem>>) attributes {dimension_semantics = [#tpu.dimension_semantics<parallel>], iteration_bounds = array<i64: 2>, scalar_prefetch = 0 : i64, scratch_operands = 0 : i64, tpu.core_type = #tpu.core_type<tc>, window_params = [{transform_indices = @transform_0, window_bounds = array<i64: 32, 8>}, {pipeline_mode = #tpu.pipeline_mode<synchronous>, transform_indices = @transform_1, window_bounds = array<i64: 8, 32>}, {pipeline_mode = #tpu.pipeline_mode<synchronous>, transform_indices = @transform_2, window_bounds = array<i64: 1, 32>}, {pipeline_mode = #tpu.pipeline_mode<synchronous>, transform_indices = @transform_3, window_bounds = array<i64: 32, 64>}, {pipeline_mode = #tpu.pipeline_mode<synchronous>, transform_indices = @transform_4, window_bounds = array<i64: 1, 64>}, {pipeline_mode = #tpu.pipeline_mode<synchronous>, transform_indices = @transform_5, window_bounds = array<i64: 64, 32>}, {pipeline_mode = #tpu.pipeline_mode<synchronous>, transform_indices = @transform_6, window_bounds = array<i64: 1, 32>}, {pipeline_mode = #tpu.pipeline_mode<synchronous>, transform_indices = @transform_7, window_bounds = array<i64: 32, 128>}, {pipeline_mode = #tpu.pipeline_mode<synchronous>, transform_indices = @transform_8, window_bounds = array<i64: 1, 128>}, {transform_indices = @transform_9, window_bounds = array<i64: 32, 128>}]} {
    %c0 = arith.constant 0 : index
    %c0_0 = arith.constant 0 : index
    %0 = vector.load %arg1[%c0, %c0_0] : memref<32x8xf32, #tpu.memory_space<vmem>>, vector<32x8xf32>
    %c0_1 = arith.constant 0 : index
    %c0_2 = arith.constant 0 : index
    %1 = vector.load %arg2[%c0_1, %c0_2] : memref<8x32xf32, #tpu.memory_space<vmem>>, vector<8x32xf32>
    %cst = arith.constant dense<0.000000e+00> : vector<32x32xf32>
    %2 = tpu.matmul %0, %1, %cst {dimension_numbers = #tpu.dot_dimension_numbers<[1], [0], [0], [1], [0, 0, 1, 1], [], []>} : vector<32x8xf32>, vector<8x32xf32>, vector<32x32xf32> -> vector<32x32xf32>
    %c0_3 = arith.constant 0 : index
    %c0_4 = arith.constant 0 : index
    %3 = vector.load %arg3[%c0_3, %c0_4] : memref<1x32xf32, #tpu.memory_space<vmem>>, vector<1x32xf32>
    %4 = vector.broadcast %3 : vector<1x32xf32> to vector<32x32xf32>
    %5 = arith.addf %2, %4 : vector<32x32xf32>
    %cst_5 = arith.constant 0.000000e+00 : f32
    %6 = vector.broadcast %cst_5 : f32 to vector<32x32xf32>
    %7 = arith.maximumf %5, %6 : vector<32x32xf32>
    %c0_6 = arith.constant 0 : index
    %c0_7 = arith.constant 0 : index
    %8 = vector.load %arg4[%c0_6, %c0_7] : memref<32x64xf32, #tpu.memory_space<vmem>>, vector<32x64xf32>
    %cst_8 = arith.constant dense<0.000000e+00> : vector<32x64xf32>
    %9 = tpu.matmul %7, %8, %cst_8 {dimension_numbers = #tpu.dot_dimension_numbers<[1], [0], [0], [1], [0, 0, 1, 1], [], []>} : vector<32x32xf32>, vector<32x64xf32>, vector<32x64xf32> -> vector<32x64xf32>
    %c0_9 = arith.constant 0 : index
    %c0_10 = arith.constant 0 : index
    %10 = vector.load %arg5[%c0_9, %c0_10] : memref<1x64xf32, #tpu.memory_space<vmem>>, vector<1x64xf32>
    %11 = vector.broadcast %10 : vector<1x64xf32> to vector<32x64xf32>
    %12 = arith.addf %9, %11 : vector<32x64xf32>
    %cst_11 = arith.constant 0.000000e+00 : f32
    %13 = vector.broadcast %cst_11 : f32 to vector<32x64xf32>
    %14 = arith.maximumf %12, %13 : vector<32x64xf32>
    %c0_12 = arith.constant 0 : index
    %c0_13 = arith.constant 0 : index
    %15 = vector.load %arg6[%c0_12, %c0_13] : memref<64x32xf32, #tpu.memory_space<vmem>>, vector<64x32xf32>
    %cst_14 = arith.constant dense<0.000000e+00> : vector<32x32xf32>
    %16 = tpu.matmul %14, %15, %cst_14 {dimension_numbers = #tpu.dot_dimension_numbers<[1], [0], [0], [1], [0, 0, 1, 1], [], []>} : vector<32x64xf32>, vector<64x32xf32>, vector<32x32xf32> -> vector<32x32xf32>
    %c0_15 = arith.constant 0 : index
    %c0_16 = arith.constant 0 : index
    %17 = vector.load %arg7[%c0_15, %c0_16] : memref<1x32xf32, #tpu.memory_space<vmem>>, vector<1x32xf32>
    %18 = vector.broadcast %17 : vector<1x32xf32> to vector<32x32xf32>
    %19 = arith.addf %16, %18 : vector<32x32xf32>
    %cst_17 = arith.constant 0.000000e+00 : f32
    %20 = vector.broadcast %cst_17 : f32 to vector<32x32xf32>
    %21 = arith.maximumf %19, %20 : vector<32x32xf32>
    %c0_18 = arith.constant 0 : index
    %c0_19 = arith.constant 0 : index
    %22 = vector.load %arg8[%c0_18, %c0_19] : memref<32x128xf32, #tpu.memory_space<vmem>>, vector<32x128xf32>
    %cst_20 = arith.constant dense<0.000000e+00> : vector<32x128xf32>
    %23 = tpu.matmul %21, %22, %cst_20 {dimension_numbers = #tpu.dot_dimension_numbers<[1], [0], [0], [1], [0, 0, 1, 1], [], []>} : vector<32x32xf32>, vector<32x128xf32>, vector<32x128xf32> -> vector<32x128xf32>
    %c0_21 = arith.constant 0 : index
    %c0_22 = arith.constant 0 : index
    %24 = vector.load %arg9[%c0_21, %c0_22] : memref<1x128xf32, #tpu.memory_space<vmem>>, vector<1x128xf32>
    %25 = vector.broadcast %24 : vector<1x128xf32> to vector<32x128xf32>
    %26 = arith.addf %23, %25 : vector<32x128xf32>
    %c0_23 = arith.constant 0 : index
    %c0_24 = arith.constant 0 : index
    %27 = vector.load %arg10[%c0_23, %c0_24] : memref<32x128xf32, #tpu.memory_space<vmem>>, vector<32x128xf32>
    tpu.vector_store %arg10[%c0_23, %c0_24], %26 {strides = array<i32>} : memref<32x128xf32, #tpu.memory_space<vmem>>, vector<32x128xf32>,
    return
  }
  func.func @transform_0(%arg0: i32) -> (i32, i32) {
    %c0_i32 = arith.constant 0 : i32
    %c0_i32_0 = arith.constant 0 : i32
    return %arg0, %c0_i32 : i32, i32
  }
  func.func @transform_1(%arg0: i32) -> (i32, i32) {
    %c0_i32 = arith.constant 0 : i32
    %c0_i32_0 = arith.constant 0 : i32
    %c0_i32_1 = arith.constant 0 : i32
    return %c0_i32, %c0_i32_0 : i32, i32
  }
  func.func @transform_2(%arg0: i32) -> (i32, i32) {
    %c0_i32 = arith.constant 0 : i32
    %c0_i32_0 = arith.constant 0 : i32
    %c0_i32_1 = arith.constant 0 : i32
    return %c0_i32, %c0_i32_0 : i32, i32
  }
  func.func @transform_3(%arg0: i32) -> (i32, i32) {
    %c0_i32 = arith.constant 0 : i32
    %c0_i32_0 = arith.constant 0 : i32
    %c0_i32_1 = arith.constant 0 : i32
    return %c0_i32, %c0_i32_0 : i32, i32
  }
  func.func @transform_4(%arg0: i32) -> (i32, i32) {
    %c0_i32 = arith.constant 0 : i32
    %c0_i32_0 = arith.constant 0 : i32
    %c0_i32_1 = arith.constant 0 : i32
    return %c0_i32, %c0_i32_0 : i32, i32
  }
  func.func @transform_5(%arg0: i32) -> (i32, i32) {
    %c0_i32 = arith.constant 0 : i32
    %c0_i32_0 = arith.constant 0 : i32
    %c0_i32_1 = arith.constant 0 : i32
    return %c0_i32, %c0_i32_0 : i32, i32
  }
  func.func @transform_6(%arg0: i32) -> (i32, i32) {
    %c0_i32 = arith.constant 0 : i32
    %c0_i32_0 = arith.constant 0 : i32
    %c0_i32_1 = arith.constant 0 : i32
    return %c0_i32, %c0_i32_0 : i32, i32
  }
  func.func @transform_7(%arg0: i32) -> (i32, i32) {
    %c0_i32 = arith.constant 0 : i32
    %c0_i32_0 = arith.constant 0 : i32
    %c0_i32_1 = arith.constant 0 : i32
    return %c0_i32, %c0_i32_0 : i32, i32
  }
  func.func @transform_8(%arg0: i32) -> (i32, i32) {
    %c0_i32 = arith.constant 0 : i32
    %c0_i32_0 = arith.constant 0 : i32
    %c0_i32_1 = arith.constant 0 : i32
    return %c0_i32, %c0_i32_0 : i32, i32
  }
  func.func @transform_9(%arg0: i32) -> (i32, i32) {
    %c0_i32 = arith.constant 0 : i32
    %c0_i32_0 = arith.constant 0 : i32
    return %arg0, %c0_i32 : i32, i32
  }
}

</mosaic_0001>

<bundles_post_ra>
// kernel: generator_mixture_forward.1
= control target key start
LH: loop header
LB: loop body
LE: loop exit
PB: predicated region body
PF: predicated region fallthrough
CT: control target
= control target key end

     0   :  { %s1036_s30 = smov 0   ;;  %s1131_s0 = inlined_call_operand.vmem [shape: f32[64,8], index: 0, kind: input, shape index: {}]   ;;  %s1132_s1 = inlined_call_operand.vmem [shape: f32[8,32], index: 1, kind: input, shape index: {}]   ;;  %s1133_s2 = inlined_call_operand.vmem [shape: f32[1,32], index: 2, kind: input, shape index: {}]   ;;  %s1134_s3 = inlined_call_operand.vmem [shape: f32[32,64], index: 3, kind: input, shape index: {}]   ;;  %s1135_s4 = inlined_call_operand.vmem [shape: f32[1,64], index: 4, kind: input, shape index: {}]   ;;  %s1136_s5 = inlined_call_operand.vmem [shape: f32[64,32], index: 5, kind: input, shape index: {}]   ;;  %s1137_s6 = inlined_call_operand.vmem [shape: f32[1,32], index: 6, kind: input, shape index: {}]   ;;  %s1138_s7 = inlined_call_operand.vmem [shape: f32[32,128], index: 7, kind: input, shape index: {}]   ;;  %s1139_s8 = inlined_call_operand.vmem [shape: f32[1,128], index: 8, kind: input, shape index: {}]   ;;  %s1140_s9 = inlined_call_operand.vmem [shape: f32[64,128], index: 9, kind: output, shape index: {}]  }
   0x1 LB: > { %s848_s10 = sadd.s32 4294967295, %s984_s30   ;;  %p852_p0 = scmp.ge.s32.totalorder %s984_s30, 1  ;;  %s984_s30 = sphi %s1036_s30, %s19_s30  }
   0x2   : > { %p288_p1 = scmp.lt.s32.totalorder %s984_s30, 3 }
   0x4   : > { %p289_p2 = pnand %p852_p0, %p288_p1 }
   0x5   : > { %s853_s13 = sshll.u32 (!%p289_p2), %s848_s10, 2 }
   0x6   : > { %292 = sbr.rel (%p289_p2) target bundleno = 818 (0x332), region = 56  ;;  %p325_p3 = scmp.lt.s32.totalorder (!%p289_p2), %s853_s13, 7 }
   0xb   : > { %v340_v0 = vld [vmem:[%s1132_s1] sm:$0xff]  ;;  %s1142_s13 = smov (!%p325_p3, %s853_s13), 7  ;;  %vm348_vm0 = vcmask 64512   ;;  %v453_v5 = vld [vmem:[%s1134_s3 + $0x18] sm:$0xff]  ;;  %v452_v6 = vld [vmem:[%s1134_s3 + $0x10] sm:$0xff]  ;;  %vm461_vm1 = vcmask 261120  }
   0xc   : > { %912 = vmatprep.subr.mxu0 %v340_v0  ;;  %s854_s14 = sshll.u32 %s1142_s13, 3  ;;  %920 = vmatprep.subr.mxu1 %v453_v5  ;;  %v451_v7 = vld [vmem:[%s1134_s3 + $0x8] sm:$0xff]  ;;  %v450_v8 = vld [vmem:[%s1134_s3] sm:$0xff]  ;;  %v570_v9 = vld [vmem:[%s1136_s5 + $0x38] sm:$0xff]  ;;  %vm578_vm2 = vcmask 523264  }
   0xd   : > { %913 = vmatpush3.msra.mxu0 %v340_v0  ;;  %s328_s17 = scalar_lea.vmem %s1131_s0, %s854_s14  ;;  %921 = vmatpush3.msra.mxu1 %v453_v5  ;;  %v569_v10 = vld [vmem:[%s1136_s5 + $0x30] sm:$0xff]  ;;  %v568_v11 = vld [vmem:[%s1136_s5 + $0x28] sm:$0xff]  ;;  %v567_v12 = vld [vmem:[%s1136_s5 + $0x20] sm:$0xff]  ;;  %s334_s24 = scalar_lea.vmem %s1140_s9, %s854_s14 }
   0xe   : > { %v336_v1 = vld [vmem:[%s328_s17] sm:$0xff]  ;;  %v337_v2 = vld [vmem:[%s328_s17 + $0x8] sm:$0xff]  ;;  %v338_v3 = vld [vmem:[%s328_s17 + $0x10] sm:$0xff]  ;;  %922 = vmatprep.subr.mxu1 %v452_v6  ;;  %934 = vmatprep.subr.mxu0 %v570_v9 }
   0xf   : > { %914 = vmatprep.mubr.msk.f32.mxu0 %vm348_vm0, %v336_v1  ;;  %v339_v4 = vld [vmem:[%s328_s17 + $0x18] sm:$0xff]  ;;  %923 = vmatpush3.msra.mxu1 %v452_v6  ;;  %v857_v13 = vld [vmem:[%s1133_s2] ss:$0 sm:$0xff]  ;;  %v565_v27 = vld [vmem:[%s1136_s5 + $0x10] sm:$0xff] }
  0x10   : > { %915 = vmatmul.mubr.msk.f32.vlgmr.msra.gmra.mxu0 %vm348_vm0, %v337_v2  ;;  %924 = vmatprep.subr.mxu1 %v451_v7  ;;  %v566_v26 = vld [vmem:[%s1136_s5 + $0x18] sm:$0xff]  ;;  %v564_v28 = vld [vmem:[%s1136_s5 + $0x8] sm:$0xff]  ;;  %v563_v29 = vld [vmem:[%s1136_s5] sm:$0xff] }
  0x11   : > { %917 = vmatprep.mubr.msk.f32.mxu0 %vm348_vm0, %v338_v3  ;;  %925 = vmatpush3.msra.mxu1 %v451_v7  ;;  %v683_v30 = vld [vmem:[%s1138_s7 + $0x18] sm:$0xff]  ;;  %v862_v31 = vld [vmem:[%s1135_s4] ss:$0 sm:$0xff]  ;;  %v682_v44 = vld [vmem:[%s1138_s7 + $0x10] sm:$0xff] }
  0x12   : > { %926 = vmatprep.subr.mxu1 %v450_v8  ;;  %935 = vmatpush3.msra.mxu0 %v570_v9  ;;  %v681_v45 = vld [vmem:[%s1138_s7 + $0x8] sm:$0xff]  ;;  %v680_v46 = vld [vmem:[%s1138_s7] sm:$0xff] }
  0x13   : > { %927 = vmatpush3.msra.mxu1 %v450_v8  ;;  %936 = vmatprep.subr.mxu0 %v569_v10  ;;  %v867_v47 = vld [vmem:[%s1137_s6] ss:$0 sm:$0xff] }
  0x14   : > { %918 = vmatmul.mubr.msk.f32.gmra.mxu0 %vm348_vm0, %v339_v4  ;;  %956 = vmatprep.subr.mxu1 %v683_v30  ;;  %v872_v61 = vld [vmem:[%s1139_s8] ss:$0 sm:$0xff] }
  0x15   : > { %937 = vmatpush3.msra.mxu0 %v569_v10 }
  0x16   : > { %938 = vmatprep.subr.mxu0 %v568_v11 }
  0x17   : > { %939 = vmatpush3.msra.mxu0 %v568_v11 }
  0x18   : > { %940 = vmatprep.subr.mxu0 %v567_v12 }
  0x19   : > { %941 = vmatpush3.msra.mxu0 %v567_v12 }
  0x1a   : > { %942 = vmatprep.subr.mxu0 %v566_v26 }
  0x1b   : > { %943 = vmatpush3.msra.mxu0 %v566_v26 }
  0x1c   : > { %944 = vmatprep.subr.mxu0 %v565_v27 }
  0x1d   : > { %945 = vmatpush3.msra.mxu0 %v565_v27 }
  0x1e   : > { %946 = vmatprep.subr.mxu0 %v564_v28 }
  0x1f   : > { %947 = vmatpush3.msra.mxu0 %v564_v28 }
  0x20   : > { %948 = vmatprep.subr.mxu0 %v563_v29 }
  0x21   : > { %949 = vmatpush3.msra.mxu0 %v563_v29 }
  0xd0   : > { %v916_v14 = vpop.f32.mrf.mxu0 }
  0xd1   : > { %v433_v15 = vadd.f32 %v916_v14, %v857_v13 }
  0xd2   : > { %v427_v16 = vpop.f32.mrf.mxu0 }
  0xd3   : > { %v428_v17 = vadd.f32 %v857_v13, %v427_v16  ;;  %v447_v20 = vmax.f32 %v433_v15, 0.0 }
  0xd4   : > { %v919_v18 = vpop.f32.mrf.mxu0 }
  0xd5   : > { %v446_v19 = vmax.f32 %v428_v17, 0.0  ;;  %v443_v21 = vadd.f32 %v919_v18, %v857_v13 }
  0xd6   : > { %v437_v22 = vpop.f32.mrf.mxu0 }
  0xd7   : > { %v438_v23 = vadd.f32 %v857_v13, %v437_v22  ;;  %928 = vmatprep.mubr.msk.f32.mxu1 %vm461_vm1, %v446_v19  ;;  %v449_v25 = vmax.f32 %v443_v21, 0.0 }
  0xd8   : > { %929 = vmatmul.mubr.msk.f32.vlgmr.msra.gmra.mxu1 %vm461_vm1, %v447_v20 }
  0xd9   : > { %v448_v24 = vmax.f32 %v438_v23, 0.0  ;;  %957 = vmatpush3.msra.mxu1 %v683_v30 }
  0xda   : > { %958 = vmatprep.subr.mxu1 %v682_v44 }
  0xdb   : > { %931 = vmatprep.mubr.msk.f32.mxu1 %vm461_vm1, %v448_v24  ;;  %959 = vmatpush3.msra.mxu1 %v682_v44 }
  0xdc   : > { %932 = vmatmul.mubr.msk.f32.gmra.mxu1 %vm461_vm1, %v449_v25  ;;  %960 = vmatprep.subr.mxu1 %v681_v45 }
  0xdd   : > { %961 = vmatpush3.msra.mxu1 %v681_v45 }
  0xde   : > { %962 = vmatprep.subr.mxu1 %v680_v46 }
  0xdf   : > { %963 = vmatpush3.msra.mxu1 %v680_v46 }
 0x198   : > { %v930_v32 = vpop.f32.mrf.mxu1 }
 0x199   : > { %v546_v33 = vadd.f32 %v930_v32, %v862_v31 }
 0x19a   : > { %v540_v34 = vpop.f32.mrf.mxu1 }
 0x19b   : > { %v541_v35 = vadd.f32 %v862_v31, %v540_v34  ;;  %v560_v38 = vmax.f32 %v546_v33, 0.0 }
 0x19c   : > { %v933_v36 = vpop.f32.mrf.mxu1 }
 0x19d   : > { %v559_v37 = vmax.f32 %v541_v35, 0.0  ;;  %v556_v39 = vadd.f32 %v933_v36, %v862_v31 }
 0x19e   : > { %v550_v40 = vpop.f32.mrf.mxu1 }
 0x19f   : > { %v551_v41 = vadd.f32 %v862_v31, %v550_v40  ;;  %950 = vmatprep.mubr.msk.f32.mxu0 %vm578_vm2, %v559_v37  ;;  %v562_v43 = vmax.f32 %v556_v39, 0.0 }
 0x1a0   : > { %951 = vmatmul.mubr.msk.f32.vlgmr.msra.gmra.mxu0 %vm578_vm2, %v560_v38 }
 0x1a1   : > { %v561_v42 = vmax.f32 %v551_v41, 0.0 }
 0x1a3   : > { %953 = vmatprep.mubr.msk.f32.mxu0 %vm578_vm2, %v561_v42 }
 0x1a4   : > { %954 = vmatmul.mubr.msk.f32.gmra.mxu0 %vm578_vm2, %v562_v43 }
 0x260   : > { %v952_v48 = vpop.f32.mrf.mxu0 }
 0x261   : > { %v663_v49 = vadd.f32 %v952_v48, %v867_v47 }
 0x262   : > { %v657_v50 = vpop.f32.mrf.mxu0 }
 0x263   : > { %v658_v51 = vadd.f32 %v867_v47, %v657_v50  ;;  %v677_v54 = vmax.f32 %v663_v49, 0.0 }
 0x264   : > { %v955_v52 = vpop.f32.mrf.mxu0 }
 0x265   : > { %v676_v53 = vmax.f32 %v658_v51, 0.0  ;;  %v673_v55 = vadd.f32 %v955_v52, %v867_v47 }
 0x266   : > { %v667_v56 = vpop.f32.mrf.mxu0 }
 0x267   : > { %v668_v57 = vadd.f32 %v867_v47, %v667_v56  ;;  %964 = vmatprep.mubr.msk.f32.mxu1 %vm461_vm1, %v676_v53  ;;  %v679_v59 = vmax.f32 %v673_v55, 0.0 }
 0x268   : > { %965 = vmatmul.mubr.msk.f32.vlgmr.msra.gmra.mxu1 %vm461_vm1, %v677_v54 }
 0x269   : > { %v678_v58 = vmax.f32 %v668_v57, 0.0 }
 0x26b   : > { %967 = vmatprep.mubr.msk.f32.mxu1 %vm461_vm1, %v678_v58 }
 0x26c   : > { %968 = vmatmul.mubr.msk.f32.gmra.mxu1 %vm461_vm1, %v679_v59 }
 0x328   : > { %v966_v60 = vpop.f32.mrf.mxu1 }
 0x329   : > { %v775_v0 = vadd.f32 %v966_v60, %v872_v61 }
 0x32a   : > { %v769_v62 = vpop.f32.mrf.mxu1 }
 0x32b   : > { %v770_v63 = vadd.f32 %v872_v61, %v769_v62  ;;  %789 = vst [vmem:[%s334_s24 + $0x8] sm:$0xff] %v775_v0 }
 0x32c   : > { %v969_v1 = vpop.f32.mrf.mxu1 }
 0x32d   : > { %788 = vst [vmem:[%s334_s24] sm:$0xff] %v770_v63  ;;  %v785_v4 = vadd.f32 %v969_v1, %v872_v61 }
 0x32e   : > { %v779_v2 = vpop.f32.mrf.mxu1 }
 0x32f   : > { %v780_v3 = vadd.f32 %v872_v61, %v779_v2  ;;  %791 = vst [vmem:[%s334_s24 + $0x18] sm:$0xff] %v785_v4 }
 0x331   : > { %790 = vst [vmem:[%s334_s24 + $0x10] sm:$0xff] %v780_v3 }
 0x332 PF: > { %s19_s30 = sadd.s32 1, %s984_s30  }
 0x333   : > { %p16_p4 = scmp.ge.s32.totalorder %s19_s30, 4  }
 0x335   :  { %18 = sbr.rel (!%p16_p4) target bundleno = 1 (0x1), region = 86 }

</bundles_post_ra>
